<compile_context>
chip_gen: v6e
topology: v6e:2x2x1
jax: 0.10.0
libtpu: 0.0.40
codegen_flags: <defaults>
</compile_context>

<pallas_src>
import jax
import jax.numpy as jnp
from jax.experimental import pallas as pl
from jax.experimental.pallas import tpu as pltpu


def _attn_kernel(full_ref, last_ref, params_ref, out_ref):
    GB, B, T, H = full_ref.shape

    # Static slices of the packed parameter slab (one DMA'd operand).
    w1t = params_ref[0:H, :]                    # (H, H)  == W1^T
    w2t = params_ref[H:2 * H, :]                # (H, H)  == W2^T
    bias = params_ref[2 * H:2 * H + 1, :]       # (1, H)  == b1 + b2 (fused)
    v = params_ref[2 * H + 8:2 * H + 9, :]      # (1, H)  == V row

    full = full_ref[...]                        # (GB, B, T, H)
    last = last_ref[...]                        # (GB, B, H)

    # Two MXU dots sharing the f32 accumulator (no lane-axis concat needed).
    proj_full = jnp.dot(full.reshape(GB * B * T, H), w2t,
                        preferred_element_type=jnp.float32) + bias   # (GB*B*T, H)
    proj_last = jnp.dot(last.reshape(GB * B, H), w1t,
                        preferred_element_type=jnp.float32)          # (GB*B, H)
    e = jnp.tanh(proj_full.reshape(GB, B, T, H)
                 + proj_last.reshape(GB, B, 1, H))                   # broadcast over T

    # V projection: VPU mul + XLU lane reduce (bV omitted: softmax-invariant).
    score = jnp.sum(e.reshape(GB * B * T, H) * v,
                    axis=-1, keepdims=True).reshape(GB, B, T, 1)

    # softmax over the sequence axis (torch dim=1 within each window).
    m = jnp.max(score, axis=2, keepdims=True)
    p = jnp.exp(score - m)
    inv = pl.reciprocal(jnp.sum(p, axis=2, keepdims=True), approx=True)
    aw = p * inv                                                      # (GB, B, T, 1)

    # attention_weights * full, summed over the batch axis (torch dim=0).
    out_ref[...] = jnp.sum(aw * full, axis=1)                         # (GB, T, H)


def _pack_params(W1, b1, W2, b2, V):
    """Pack W1^T, W2^T, b1+b2 and V into one (2H+16, H) slab (rows 8-aligned)."""
    H = W1.shape[0]
    params = jnp.zeros((2 * H + 16, H), jnp.float32)
    params = params.at[0:H, :].set(W1.T.astype(jnp.float32))
    params = params.at[H:2 * H, :].set(W2.T.astype(jnp.float32))
    params = params.at[2 * H, :].set((b1 + b2).astype(jnp.float32))
    params = params.at[2 * H + 8, :].set(V.reshape(H).astype(jnp.float32))
    return params


def attn_forward_batched(full, last, W1, b1, W2, b2, V, bV, *, windows_per_block=8):
    """Batched attn: full (G,B,T,H), last (G,B,1,H) -> (G,T,H); G independent calls."""
    del bV  # scalar added uniformly to every score before softmax over T -> no-op
    G, B, T, H = full.shape
    params = _pack_params(W1, b1, W2, b2, V)
    full = full.astype(jnp.float32)
    last2 = last.reshape(G, B, H).astype(jnp.float32)

    GB = max(1, min(windows_per_block, G))
    Gp = pl.cdiv(G, GB) * GB
    if Gp != G:
        # Zero-padded windows yield finite (uniform-weight, zero-context) outputs;
        # they are sliced off below.
        full = jnp.pad(full, ((0, Gp - G), (0, 0), (0, 0), (0, 0)))
        last2 = jnp.pad(last2, ((0, Gp - G), (0, 0), (0, 0)))

    out = pl.pallas_call(
        _attn_kernel,
        out_shape=jax.ShapeDtypeStruct((Gp, T, H), jnp.float32),
        grid=(Gp // GB,),
        in_specs=[
            pl.BlockSpec((GB, B, T, H), lambda i: (i, 0, 0, 0)),   # window blocks of `full`
            pl.BlockSpec((GB, B, H), lambda i: (i, 0, 0)),         # window blocks of `last`
            pl.BlockSpec((2 * H + 16, H), lambda i: (0, 0)),       # grid-constant params
        ],
        out_specs=pl.BlockSpec((GB, T, H), lambda i: (i, 0, 0)),
        compiler_params=pltpu.CompilerParams(
            dimension_semantics=("parallel",)),
    )(full, last2, params)
    return out[:G]


def attn_forward(full, last, W1, b1, W2, b2, V, bV):
    """Single attn.forward call (module signature): full (B,T,H), last (B,1,H) -> (T,H)."""
    out = attn_forward_batched(full[None], last[None], W1, b1, W2, b2, V, bV,
                               windows_per_block=1)
    return out[0]


if __name__ == "__main__":
    # StockNet uses attn(64, 64) on GRU outputs over an 8-step window; it calls the
    # module once per (stock, window) -> batch G of those calls in one pallas_call.
    G, B, T, H = 64, 2, 8, 64
    key = jax.random.PRNGKey(0)
    ks = jax.random.split(key, 8)

    # Deterministic init mimicking nn.Linear's U(-1/sqrt(in), 1/sqrt(in)).
    k = 1.0 / (H ** 0.5)
    W1 = jax.random.uniform(ks[0], (H, H), jnp.float32, -k, k)   # (out, in) layout
    b1 = jax.random.uniform(ks[1], (H,), jnp.float32, -k, k)
    W2 = jax.random.uniform(ks[2], (H, H), jnp.float32, -k, k)
    b2 = jax.random.uniform(ks[3], (H,), jnp.float32, -k, k)
    V = jax.random.uniform(ks[4], (1, H), jnp.float32, -k, k)
    bV = jax.random.uniform(ks[5], (1,), jnp.float32, -k, k)

    full = jax.random.normal(ks[6], (G, B, T, H), jnp.float32)
    last = jax.random.normal(ks[7], (G, B, 1, H), jnp.float32)

    out = jax.block_until_ready(
        attn_forward_batched(full, last, W1, b1, W2, b2, V, bV, windows_per_block=8))

    # Pure-JAX reference (identical math to the PyTorch forward, incl. bV).
    score_ref = jnp.tanh(last @ W1.T + b1 + full @ W2.T + b2) @ V.T + bV   # (G,B,T,1)
    aw_ref = jax.nn.softmax(score_ref, axis=2)       # torch softmax(dim=1) per window
    ref = jnp.sum(aw_ref * full, axis=1)             # torch sum(dim=0) per window -> (G,T,H)

    assert out.shape == (G, T, H)
    err = jnp.max(jnp.abs(out - ref))
    # Tolerance loosened slightly for pl.reciprocal(approx=True) in the softmax.
    assert jnp.allclose(out, ref, atol=2e-3, rtol=2e-3), f"max err {err}"

    # Also exercise the single-call wrapper (the module's exact forward signature).
    out1 = jax.block_until_ready(
        attn_forward(full[0], last[0], W1, b1, W2, b2, V, bV))
    assert jnp.allclose(out1, ref[0], atol=2e-3, rtol=2e-3)

    print("KERNEL_OK")
</pallas_src>

<mosaic_0001>
module attributes {stable_mosaic.version = 11 : i64} {
  func.func @_attn_kernel(%arg0: i32, %arg1: memref<8x2x8x64xf32, #tpu.memory_space<vmem>>, %arg2: memref<8x2x64xf32, #tpu.memory_space<vmem>>, %arg3: memref<144x64xf32, #tpu.memory_space<vmem>>, %arg4: memref<8x8x64xf32, #tpu.memory_space<vmem>>) attributes {dimension_semantics = [#tpu.dimension_semantics<parallel>], iteration_bounds = array<i64: 8>, scalar_prefetch = 0 : i64, scratch_operands = 0 : i64, tpu.core_type = #tpu.core_type<tc>, window_params = [{transform_indices = @transform_0, window_bounds = array<i64: 8, 2, 8, 64>}, {transform_indices = @transform_1, window_bounds = array<i64: 8, 2, 64>}, {pipeline_mode = #tpu.pipeline_mode<synchronous>, transform_indices = @transform_2, window_bounds = array<i64: 144, 64>}, {transform_indices = @transform_3, window_bounds = array<i64: 8, 8, 64>}]} {
    %c0 = arith.constant 0 : index
    %c0_0 = arith.constant 0 : index
    %0 = vector.load %arg3[%c0, %c0_0] : memref<144x64xf32, #tpu.memory_space<vmem>>, vector<64x64xf32>
    %c64 = arith.constant 64 : index
    %c0_1 = arith.constant 0 : index
    %1 = vector.load %arg3[%c64, %c0_1] : memref<144x64xf32, #tpu.memory_space<vmem>>, vector<64x64xf32>
    %c128 = arith.constant 128 : index
    %c0_2 = arith.constant 0 : index
    %2 = vector.load %arg3[%c128, %c0_2] : memref<144x64xf32, #tpu.memory_space<vmem>>, vector<1x64xf32>
    %c136 = arith.constant 136 : index
    %c0_3 = arith.constant 0 : index
    %3 = vector.load %arg3[%c136, %c0_3] : memref<144x64xf32, #tpu.memory_space<vmem>>, vector<1x64xf32>
    %c0_4 = arith.constant 0 : index
    %c0_5 = arith.constant 0 : index
    %c0_6 = arith.constant 0 : index
    %c0_7 = arith.constant 0 : index
    %4 = vector.load %arg1[%c0_4, %c0_5, %c0_6, %c0_7] : memref<8x2x8x64xf32, #tpu.memory_space<vmem>>, vector<8x2x8x64xf32>
    %c0_8 = arith.constant 0 : index
    %c0_9 = arith.constant 0 : index
    %c0_10 = arith.constant 0 : index
    %5 = vector.load %arg2[%c0_8, %c0_9, %c0_10] : memref<8x2x64xf32, #tpu.memory_space<vmem>>, vector<8x2x64xf32>
    %6 = vector.shape_cast %4 : vector<8x2x8x64xf32> to vector<128x64xf32>
    %cst = arith.constant dense<0.000000e+00> : vector<128x64xf32>
    %7 = tpu.matmul %6, %1, %cst {dimension_numbers = #tpu.dot_dimension_numbers<[1], [0], [0], [1], [0, 0, 1, 1], [], []>} : vector<128x64xf32>, vector<64x64xf32>, vector<128x64xf32> -> vector<128x64xf32>
    %8 = vector.broadcast %2 : vector<1x64xf32> to vector<128x64xf32>
    %9 = arith.addf %7, %8 : vector<128x64xf32>
    %10 = vector.shape_cast %5 : vector<8x2x64xf32> to vector<16x64xf32>
    %cst_11 = arith.constant dense<0.000000e+00> : vector<16x64xf32>
    %11 = tpu.matmul %10, %0, %cst_11 {dimension_numbers = #tpu.dot_dimension_numbers<[1], [0], [0], [1], [0, 0, 1, 1], [], []>} : vector<16x64xf32>, vector<64x64xf32>, vector<16x64xf32> -> vector<16x64xf32>
    %12 = vector.shape_cast %9 : vector<128x64xf32> to vector<8x2x8x64xf32>
    %13 = vector.shape_cast %11 : vector<16x64xf32> to vector<8x2x1x64xf32>
    %14 = vector.broadcast %13 : vector<8x2x1x64xf32> to vector<8x2x8x64xf32>
    %15 = arith.addf %12, %14 : vector<8x2x8x64xf32>
    %16 = math.tanh %15 : vector<8x2x8x64xf32>
    %17 = vector.shape_cast %16 : vector<8x2x8x64xf32> to vector<128x64xf32>
    %18 = vector.broadcast %3 : vector<1x64xf32> to vector<128x64xf32>
    %19 = arith.mulf %17, %18 : vector<128x64xf32>
    %cst_12 = arith.constant dense<0.000000e+00> : vector<128xf32>
    %20 = vector.multi_reduction <add>, %19, %cst_12 [1] : vector<128x64xf32> to vector<128xf32>
    %21 = vector.shape_cast %20 : vector<128xf32> to vector<128x1xf32>
    %22 = vector.shape_cast %21 : vector<128x1xf32> to vector<8x2x8x1xf32>
    %cst_13 = arith.constant dense<0xFF800000> : vector<8x2x1xf32>
    %23 = vector.multi_reduction <maximumf>, %22, %cst_13 [2] : vector<8x2x8x1xf32> to vector<8x2x1xf32>
    %24 = vector.shape_cast %23 : vector<8x2x1xf32> to vector<8x2x1x1xf32>
    %25 = vector.broadcast %24 : vector<8x2x1x1xf32> to vector<8x2x8x1xf32>
    %26 = arith.subf %22, %25 : vector<8x2x8x1xf32>
    %27 = math.exp %26 : vector<8x2x8x1xf32>
    %cst_14 = arith.constant dense<0.000000e+00> : vector<8x2x1xf32>
    %28 = vector.multi_reduction <add>, %27, %cst_14 [2] : vector<8x2x8x1xf32> to vector<8x2x1xf32>
    %29 = vector.shape_cast %28 : vector<8x2x1xf32> to vector<8x2x1x1xf32>
    %30 = tpu.reciprocal %29 {approx = true} : vector<8x2x1x1xf32> -> vector<8x2x1x1xf32>
    %31 = vector.broadcast %30 : vector<8x2x1x1xf32> to vector<8x2x8x1xf32>
    %32 = arith.mulf %27, %31 : vector<8x2x8x1xf32>
    %33 = vector.broadcast %32 : vector<8x2x8x1xf32> to vector<8x2x8x64xf32>
    %34 = arith.mulf %33, %4 : vector<8x2x8x64xf32>
    %cst_15 = arith.constant dense<0.000000e+00> : vector<8x8x64xf32>
    %35 = vector.multi_reduction <add>, %34, %cst_15 [1] : vector<8x2x8x64xf32> to vector<8x8x64xf32>
    %c0_16 = arith.constant 0 : index
    %c0_17 = arith.constant 0 : index
    %c0_18 = arith.constant 0 : index
    %36 = vector.load %arg4[%c0_16, %c0_17, %c0_18] : memref<8x8x64xf32, #tpu.memory_space<vmem>>, vector<8x8x64xf32>
    tpu.vector_store %arg4[%c0_16, %c0_17, %c0_18], %35 {strides = array<i32>} : memref<8x8x64xf32, #tpu.memory_space<vmem>>, vector<8x8x64xf32>,
    return
  }
  func.func @transform_0(%arg0: i32) -> (i32, i32, i32, i32) {
    %c0_i32 = arith.constant 0 : i32
    %c0_i32_0 = arith.constant 0 : i32
    %c0_i32_1 = arith.constant 0 : i32
    %c0_i32_2 = arith.constant 0 : i32
    return %arg0, %c0_i32, %c0_i32_0, %c0_i32_1 : i32, i32, i32, i32
  }
  func.func @transform_1(%arg0: i32) -> (i32, i32, i32) {
    %c0_i32 = arith.constant 0 : i32
    %c0_i32_0 = arith.constant 0 : i32
    %c0_i32_1 = arith.constant 0 : i32
    return %arg0, %c0_i32, %c0_i32_0 : i32, i32, i32
  }
  func.func @transform_2(%arg0: i32) -> (i32, i32) {
    %c0_i32 = arith.constant 0 : i32
    %c0_i32_0 = arith.constant 0 : i32
    %c0_i32_1 = arith.constant 0 : i32
    return %c0_i32, %c0_i32_0 : i32, i32
  }
  func.func @transform_3(%arg0: i32) -> (i32, i32, i32) {
    %c0_i32 = arith.constant 0 : i32
    %c0_i32_0 = arith.constant 0 : i32
    %c0_i32_1 = arith.constant 0 : i32
    return %arg0, %c0_i32, %c0_i32_0 : i32, i32, i32
  }
}

</mosaic_0001>

<bundles_post_ra>
// kernel: tpu_custom_call.1
= control target key start
LH: loop header
LB: loop body
LE: loop exit
PB: predicated region body
PF: predicated region fallthrough
CT: control target
= control target key end

     0   :  { %8 = vsyncpa [#allocation3], 0  ;;  %s2211_s0 = inlined_call_operand.hbm [shape: f32[64,2,8,64], index: 0, kind: input, shape index: {}]   ;;  %s2212_s1 = inlined_call_operand.vmem [shape: f32[64,2,64], index: 1, kind: input, shape index: {}]   ;;  %s2213_s2 = inlined_call_operand.vmem [shape: f32[144,64], index: 2, kind: input, shape index: {}]   ;;  %s2214_s3 = inlined_call_operand.hbm [shape: f32[64,8,64], index: 3, kind: output, shape index: {}]  }
   0x1   :  { %10 = vsyncpa [#allocation3 + $0x1], 0 }
   0x2   :  { %11 = vsyncpa [#allocation4], 0 }
   0x3   :  { %13 = vsyncpa [#allocation4 + $0x1], 0  ;;  %s1685_s12 = smov 0   ;;  %s1687_s13 = smov 0  }
   0x4   :  { %s1689_s14 = smov 0   ;;  %s1691_s15 = smov 0  }
   0x5 LB: > { %s1706_s16 = sadd.s32 4294967295, %s1655_s15   ;;  %s1274_s17 = sadd.s32 4294967294, %s1655_s15   ;;  %s1655_s15 = sphi %s1691_s15, %s2228_s15   ;;  %s1651_s14 = sphi %s1689_s14, %s2227_s14   ;;  %s1647_s13 = sphi %s1687_s13, %s2226_s13   ;;  %s1643_s12 = sphi %s1685_s12, %s2225_s12  }
   0x6   : > { %s1710_s18 = sadd.s32 1, %s1655_s15   ;;  %s26_s19 = sadd.s32 1, %s1651_s14 }
   0x7   : > { %s23_s20 = ssub.s32 %s1655_s15, %s1710_s18  ;;  %p33_p0 = scmp.ne.s32.totalorder %s1651_s14, %s1647_s13 }
   0x8   : > { %p24_p1 = scmp.eq.s32.totalorder %s23_s20, 0  ;;  %p34_p2 = scmp.eq.s32.totalorder %s1655_s15, 0 }
   0x9   : > { %p39_p3 = scmp.ne.s32.totalorder %s1647_s13, %s1643_s12  ;;  %p40_p4 = scmp.eq.s32.totalorder %s1706_s16, 0 }
   0xa   : > { %s1722_s21 = scalar_select %p24_p1, %s1651_s14, %s26_s19  }
   0xb   : > { %p1724_p5 = por %p34_p2, %p33_p0  ;;  %p1728_p6 = por %p40_p4, %p39_p3 }
   0xc   : > { %p110_p7 = scmp.eq.s32.totalorder %s1706_s16, 7  ;;  %p116_p8 = scmp.eq.s32.totalorder %s1274_s17, 7 }
   0xd   : > { %s2218_s23 = scalar_select %p1728_p6, 1, 0 }
   0xe   : > { %p1419_p9 = scmp.lt.s32.totalorder %s1655_s15, 8  ;;  %p1734_p10 = por %p110_p7, %p33_p0 }
   0xf   : > { %p1738_p11 = por %p116_p8, %p39_p3  ;;  %s139_s26 = sand.u32 1, %s1651_s14  }
  0x10   : > { %s2219_s24 = scalar_select %p1734_p10, 1, 0 }
  0x11   : > { %s2220_s25 = scalar_select %p1738_p11, 1, 0 }
  0x12   : > { %s1312_s27 = sshll.u32 %s1655_s15, 11  ;;  %s1277_s28 = sshll.u32 %s139_s26, 7 }
  0x13   : > { %s1747_s4 = scalar_lea.hbm %s2211_s0, %s1312_s27  ;;  %s143_s5 = scalar_lea.vmem [#allocation2], %s1277_s28 }
  0x14   : > { %s151_s6 = sshll.u32 %s143_s5, 4  ;;  %p1751_p12 = pnand %p1419_p9, %p1724_p5  ;;  %s1755_s6 = int_to_ptr.vmem [resolvable:$true] %s151_s6 }
  0x15   : > { %s1757_s8 = scalar_lea.sflag [#allocation3], %s139_s26  ;;  %s1563_s9 = scalar_lea.hbm %s1747_s4, 2048 }
  0x16   : > { %p1564_p13 = scmp.ne.s32.totalorder %s1747_s4, %s1563_s9  ;;  %p1565_p0 = pneg %p1751_p12 }
  0x17   : > { %s1568_s17 = scalar_lea.hbm %s2211_s0, 16384  ;;  %p1569_p3 = scmp.lt.s32.totalorder %s1747_s4, %s2211_s0 }
  0x18   : > { %p1566_p1 = pnand %p1565_p0, %p1564_p13  ;;  %p1570_p4 = scmp.lt.s32.totalorder %s1568_s17, %s1563_s9 }
  0x1a   : > { %p1567_p2 = pneg %p1566_p1  ;;  %p1571_p5 = por %p1570_p4, %p1569_p3 }
  0x1c   : > { %p1572_p7 = pnand %p1571_p5, %p1567_p2 }
  0x1e   : > { %1575 = shalt.err (!%p1572_p7)
}
  0x1f   : > { %s1576_s22 = scalar_lea.vmem %s1755_s6, 2048  ;;  %s1657_s26 = smov [#allocation2]  }
  0x20   : > { %p1577_p8 = scmp.ne.s32.totalorder %s1755_s6, %s1576_s22  ;;  %s1581_s27 = sshll.u32 %s1657_s26, 4  ;;  %s1582_s27 = int_to_ptr.vmem [resolvable:$false] %s1581_s27 }
  0x21   : > { %s1583_s28 = scalar_lea.vmem %s1582_s27, 4096  ;;  %p1584_p1 = scmp.lt.s32.totalorder %s1755_s6, %s1582_s27 }
  0x22   : > { %p1579_p9 = pnand %p1577_p8, %p1565_p0  ;;  %p1585_p11 = scmp.lt.s32.totalorder %s1583_s28, %s1576_s22 }
  0x24   : > { %p1580_p13 = pneg %p1579_p9  ;;  %p1586_p10 = por %p1585_p11, %p1584_p1 }
  0x26   : > { %p1587_p6 = pnand %p1586_p10, %p1580_p13 }
  0x28   : > { %1590 = shalt.err (!%p1587_p6)
}
  0x29   : > { %s1658_s29 = smov 128   ;;  %s1659_s30 = smov 8  }
  0x2a   : > { %1414 = dma.hbm_to_vmem [thread:$0]  (!%p1751_p12), %s1747_s4, 2048, %s1755_s6, %s1757_s8, %s1658_s29, %s1658_s29, %s1659_s30  }
  0x2b   : > { %p1281_p0 = scmp.ge.s32.totalorder %s1655_s15, 1  ;;  %p168_p2 = scmp.lt.s32.totalorder %s1655_s15, 9 }
  0x2d   : > { %p169_p3 = pnand %p1281_p0, %p168_p2 }
  0x2e   : > { %s1781_s5 = sand.u32 (!%p169_p3), 1, %s1647_s13   ;;  %p2222_p6 = scmp.ne.s32.totalorder (!%p169_p3), %s2218_s23, 0 }
  0x2f   : > { %172 = sbr.rel (%p169_p3) target bundleno = 567 (0x237), region = 32  ;;  %s1282_s9 = sshll.u32 (!%p169_p3), %s1781_s5, 7 }
  0x30   : > { %s175_s10 = scalar_lea.sflag (!%p169_p3), [#allocation3], %s1781_s5  ;;  %s1785_s11 = scalar_lea.vmem (!%p169_p3), [#allocation2], %s1282_s9 }
  0x34   : > { %1634 = dma.done.wait (%p2222_p6), %s175_s10, 2048  }
  0x35   : > { %1636 = vsyncadd (%p2222_p6), %s175_s10, 4294965248  ;;  %s1284_s4 = sshll.u32 %s1706_s16, 3  ;;  %v1660_v0 = vmov 1983009808   ;;  %v467_v2 = vlaneseq  ;;  %v229_v3 = vld [vmem:[%s2213_s2 + $0x78] sm:$0xff]  ;;  %v228_v5 = vld [vmem:[%s2213_s2 + $0x70] sm:$0xff] }
  0x36   : > { %p208_p10 = scmp.lt.s32.totalorder %s1284_s4, 63  ;;  %v465_v1 = vunpack.c.l.s4 %v1660_v0  ;;  %v221_v4 = vld [vmem:[%s2213_s2 + $0x38] sm:$0xff]  ;;  %1348 = vmatprep.subr.mxu0 %v229_v3  ;;  %v220_v6 = vld [vmem:[%s2213_s2 + $0x30] sm:$0xff]  ;;  %v227_v9 = vld [vmem:[%s2213_s2 + $0x68] sm:$0xff]  ;;  %vm260_vm0 = vcmask 523264   ;;  %s1283_s26 = sshll.u32 %s1781_s5, 6 }
  0x37   : > { %1388 = vmatprep.subr.mxu1 %v221_v4  ;;  %v1804_v8 = vshrl.u32 %v467_v2, 7  ;;  %1349 = vmatpush3.msra.mxu0 %v229_v3  ;;  %v219_v10 = vld [vmem:[%s2213_s2 + $0x28] sm:$0xff]  ;;  %v226_v11 = vld [vmem:[%s2213_s2 + $0x60] sm:$0xff]  ;;  %v225_v13 = vld [vmem:[%s2213_s2 + $0x58] sm:$0xff]  ;;  %v1661_v56 = vmov 1966171168  }
  0x38   : > { %s2230_s4 = smov (!%p208_p10, %s1284_s4), 63  ;;  %v466_v7 = vunpack.c.0.s8 %v465_v1  ;;  %1389 = vmatpush3.msra.mxu1 %v221_v4  ;;  %1350 = vmatprep.subr.mxu0 %v228_v5  ;;  %v218_v12 = vld [vmem:[%s2213_s2 + $0x20] sm:$0xff]  ;;  %v217_v14 = vld [vmem:[%s2213_s2 + $0x18] sm:$0xff]  ;;  %v224_v20 = vld [vmem:[%s2213_s2 + $0x50] sm:$0xff]  ;;  %v579_v57 = vunpack.c.l.s4 %v1661_v56  ;;  %s2112_s27 = scalar_lea.vmem [#allocation5], %s1283_s26 }
  0x39   : > { %s1285_s6 = sshll.u32 %s2230_s4, 1  ;;  %1390 = vmatprep.subr.mxu1 %v220_v6  ;;  %1351 = vmatpush3.msra.mxu0 %v228_v5  ;;  %v216_v25 = vld [vmem:[%s2213_s2 + $0x10] sm:$0xff]  ;;  %v223_v32 = vld [vmem:[%s2213_s2 + $0x48] sm:$0xff]  ;;  %v222_v36 = vld [vmem:[%s2213_s2 + $0x40] sm:$0xff]  ;;  %s1313_s28 = sshll.u32 %s1706_s16, 10 }
  0x3a   : > { %s211_s4 = scalar_lea.vmem %s2212_s1, %s1285_s6  ;;  %1391 = vmatpush3.msra.mxu1 %v220_v6  ;;  %1352 = vmatprep.subr.mxu0 %v227_v9  ;;  %v469_v16 = vsub.s32 %v466_v7, %v1804_v8  ;;  %v215_v33 = vld [vmem:[%s2213_s2 + $0x8] sm:$0xff]  ;;  %v214_v37 = vld [vmem:[%s2213_s2] sm:$0xff]  ;;  %v1855_v42 = vld [vmem:[%s1785_s11 + $0x10] sm:$0xff]  ;;  %v580_v58 = vunpack.c.0.s8 %v579_v57  ;;  %s1189_s29 = sshll.u32 %s2112_s27, 4  ;;  %s2167_s29 = int_to_ptr.vmem [resolvable:$true] %s1189_s29 }
  0x3b   : > { %1392 = vmatprep.subr.mxu1 %v219_v10  ;;  %v248_v15 = vld [vmem:[%s211_s4] sm:$0x3]  ;;  %1353 = vmatpush3.msra.mxu0 %v227_v9  ;;  %v249_v17 = vld [vmem:[%s211_s4 + $0x2] sm:$0x3]  ;;  %v250_v18 = vld [vmem:[%s211_s4 + $0x4] sm:$0x3]  ;;  %s2165_s10 = scalar_lea.hbm %s2214_s3, %s1313_s28 }
  0x3c   : > { %1393 = vmatpush3.msra.mxu1 %v219_v10  ;;  %v251_v19 = vld [vmem:[%s211_s4 + $0x6] sm:$0x3]  ;;  %1354 = vmatprep.subr.mxu0 %v226_v11  ;;  %v462_v21 = vcombine.low %v248_v15, %v249_v17  ;;  %v252_v23 = vld [vmem:[%s211_s4 + $0x8] sm:$0x3]  ;;  %v253_v24 = vld [vmem:[%s211_s4 + $0xa] sm:$0x3]  ;;  %v1905_v61 = vsub.s32 %v580_v58, %v1804_v8 }
  0x3d   : > { %1394 = vmatprep.subr.mxu1 %v218_v12  ;;  %v463_v22 = vcombine.low %v250_v18, %v251_v19  ;;  %1355 = vmatpush3.msra.mxu0 %v226_v11  ;;  %v254_v26 = vld [vmem:[%s211_s4 + $0xc] sm:$0x3]  ;;  %v255_v27 = vld [vmem:[%s211_s4 + $0xe] sm:$0x3]  ;;  %v479_v28 = vcombine.low %v252_v23, %v253_v24  ;;  %v1847_v38 = vld [vmem:[%s1785_s11] sm:$0xff]  ;;  %v1916_v9 = vsub.s32 0, %v1804_v8 }
  0x3e   : > { %1395 = vmatpush3.msra.mxu1 %v218_v12  ;;  %1356 = vmatprep.subr.mxu0 %v225_v13  ;;  %v470_v29 = vrot.slane %v462_v21, %v469_v16  ;;  %v480_v31 = vcombine.low %v254_v26, %v255_v27  ;;  %v1850_v41 = vld [vmem:[%s1785_s11 + $0x8] sm:$0xff]  ;;  %v1864_v43 = vld [vmem:[%s1785_s11 + $0x18] sm:$0xff]  ;;  %v1867_v44 = vld [vmem:[%s1785_s11 + $0x20] sm:$0xff]  ;;  %s1176_s16 = scalar_lea.sflag [#allocation4], %s1781_s5  ;;  %p2223_p12 = scmp.ne.s32.totalorder %s2219_s24, 0 }
  0x3f   : > { %1396 = vmatprep.subr.mxu1 %v217_v14  ;;  %v477_v30 = vrot.slane %v463_v22, %v469_v16  ;;  %1357 = vmatpush3.msra.mxu0 %v225_v13  ;;  %v487_v34 = vrot.slane %v479_v28, %v469_v16  ;;  %v1874_v45 = vld [vmem:[%s1785_s11 + $0x28] sm:$0xff]  ;;  %v1877_v46 = vld [vmem:[%s1785_s11 + $0x30] sm:$0xff]  ;;  %v1884_v47 = vld [vmem:[%s1785_s11 + $0x38] sm:$0xff]  ;;  %s1662_s7 = smov [#allocation5]  }
  0x40   : > { %1397 = vmatpush3.msra.mxu1 %v217_v14  ;;  %1358 = vmatprep.subr.mxu0 %v224_v20  ;;  %v494_v35 = vrot.slane %v480_v31, %v469_v16  ;;  %v240_v48 = vld [vmem:[%s1785_s11 + $0x40] sm:$0xff]  ;;  %v241_v49 = vld [vmem:[%s1785_s11 + $0x48] sm:$0xff]  ;;  %v242_v50 = vld [vmem:[%s1785_s11 + $0x50] sm:$0xff]  ;;  %s1595_s4 = sshll.u32 %s1662_s7, 4  ;;  %s1596_s4 = int_to_ptr.vmem [resolvable:$false] %s1595_s4 }
  0x41   : > { %1398 = vmatprep.subr.mxu1 %v216_v25  ;;  %1359 = vmatpush3.msra.mxu0 %v224_v20  ;;  %v478_v39 = vcombine.low %v470_v29, %v477_v30  ;;  %v243_v51 = vld [vmem:[%s1785_s11 + $0x58] sm:$0xff]  ;;  %v244_v52 = vld [vmem:[%s1785_s11 + $0x60] sm:$0xff]  ;;  %v245_v53 = vld [vmem:[%s1785_s11 + $0x68] sm:$0xff]  ;;  %s1597_s8 = scalar_lea.vmem %s1596_s4, 2048  ;;  %p1598_p7 = scmp.lt.s32.totalorder %s2167_s29, %s1596_s4 }
  0x42   : > { %1399 = vmatpush3.msra.mxu1 %v216_v25  ;;  %1360 = vmatprep.subr.mxu0 %v223_v32  ;;  %v495_v40 = vcombine.low %v487_v34, %v494_v35  ;;  %v246_v54 = vld [vmem:[%s1785_s11 + $0x70] sm:$0xff]  ;;  %v247_v55 = vld [vmem:[%s1785_s11 + $0x78] sm:$0xff]  ;;  %v1910_v0 = vld [vmem:[%s2213_s2 + $0x80] ss:$0 sm:$0xff] }
  0x43   : > { %1400 = vmatprep.subr.mxu1 %v215_v33  ;;  %1361 = vmatpush3.msra.mxu0 %v223_v32 }
  0x44   : > { %1401 = vmatpush3.msra.mxu1 %v215_v33  ;;  %1362 = vmatprep.subr.mxu0 %v222_v36 }
  0x45   : > { %1402 = vmatprep.subr.mxu1 %v214_v37  ;;  %1363 = vmatpush3.msra.mxu0 %v222_v36 }
  0x46   : > { %1364 = vmatprep.mubr.msk.f32.mxu0 %vm260_vm0, %v1847_v38  ;;  %1403 = vmatpush3.msra.mxu1 %v214_v37 }
  0x47   : > { %1404 = vmatprep.mubr.msk.f32.mxu1 %vm260_vm0, %v478_v39  ;;  %1365 = vmatmul.mubr.msk.f32.vlgmr.msra.gmra.mxu0 %vm260_vm0, %v1850_v41 }
  0x48   : > { %1405 = vmatmul.mubr.msk.f32.vlgmr.msra.gmra.mxu1 %vm260_vm0, %v495_v40  ;;  %1367 = vmatprep.mubr.msk.f32.mxu0 %vm260_vm0, %v1855_v42 }
  0x4b   : > { %1368 = vmatmul.mubr.msk.f32.gmra.mxu0 %vm260_vm0, %v1864_v43 }
  0x4c   : > { %1370 = vmatprep.mubr.msk.f32.mxu0 %vm260_vm0, %v1867_v44 }
  0x4f   : > { %1371 = vmatmul.mubr.msk.f32.gmra.mxu0 %vm260_vm0, %v1874_v45 }
  0x50   : > { %1373 = vmatprep.mubr.msk.f32.mxu0 %vm260_vm0, %v1877_v46 }
  0x53   : > { %1374 = vmatmul.mubr.msk.f32.gmra.mxu0 %vm260_vm0, %v1884_v47 }
  0x54   : > { %1376 = vmatprep.mubr.msk.f32.mxu0 %vm260_vm0, %v240_v48 }
  0x57   : > { %1377 = vmatmul.mubr.msk.f32.gmra.mxu0 %vm260_vm0, %v241_v49 }
  0x58   : > { %1379 = vmatprep.mubr.msk.f32.mxu0 %vm260_vm0, %v242_v50 }
  0x5b   : > { %1380 = vmatmul.mubr.msk.f32.gmra.mxu0 %vm260_vm0, %v243_v51 }
  0x5c   : > { %1382 = vmatprep.mubr.msk.f32.mxu0 %vm260_vm0, %v244_v52 }
  0x5f   : > { %1383 = vmatmul.mubr.msk.f32.gmra.mxu0 %vm260_vm0, %v245_v53 }
  0x60   : > { %1385 = vmatprep.mubr.msk.f32.mxu0 %vm260_vm0, %v246_v54 }
  0x63   : > { %1386 = vmatmul.mubr.msk.f32.gmra.mxu0 %vm260_vm0, %v247_v55 }
 0x107   : > { %v1366_v59 = vpop.f32.mrf.mxu0 }
 0x108   : > { %v1406_v60 = vpop.f32.mrf.mxu1  ;;  %v381_v10 = vadd.f32 %v1366_v59, %v1910_v0 }
 0x109   : > { %v375_v62 = vpop.f32.mrf.mxu0  ;;  %v633_v11 = vrot.slane %v1406_v60, %v1905_v61  ;;  %v626_v37 = vcombine.high %v1406_v60, %v1406_v60 }
 0x10a   : > { %v566_v63 = vpop.f32.mrf.mxu1  ;;  %v376_v12 = vadd.f32 %v1910_v0, %v375_v62 }
 0x10b   : > { %v577_v1 = vcombine.high %v566_v63, %v566_v63  ;;  %v584_v2 = vrot.slane %v566_v63, %v1905_v61  ;;  %v1369_v3 = vpop.f32.mrf.mxu0  ;;  %v641_v35 = vcombine.high %v633_v11, %v633_v11  ;;  %v649_v49 = vrot.slane %v633_v11, %v1905_v61 }
 0x10c   : > { %v391_v19 = vadd.f32 %v1369_v3, %v1910_v0  ;;  %v640_v58 = vrot.slane %v626_v37, %v1905_v61 }
 0x10d   : > { %v591_v4 = vrot.slane %v577_v1, %v1905_v61  ;;  %v592_v5 = vcombine.high %v584_v2, %v584_v2  ;;  %v600_v6 = vrot.slane %v584_v2, %v1905_v61  ;;  %v385_v7 = vpop.f32.mrf.mxu0  ;;  %v663_v56 = vrot.slane %v641_v35, %v1905_v61 }
 0x10e   : > { %v386_v8 = vadd.f32 %v1910_v0, %v385_v7  ;;  %v671_v60 = vcombine.high %v649_v49, %v649_v49  ;;  %v710_v63 = vrot.slane %v649_v49, %v1916_v9  ;;  %v656_v7 = vrot.slane %v640_v58, %v1905_v61 }
 0x10f   : > { %v593_v13 = vcombine.high %v591_v4, %v591_v4  ;;  %v607_v14 = vrot.slane %v591_v4, %v1905_v61  ;;  %v614_v15 = vrot.slane %v592_v5, %v1905_v61  ;;  %v622_v16 = vcombine.high %v600_v6, %v600_v6  ;;  %v1372_v17 = vpop.f32.mrf.mxu0 }
 0x110   : > { %v678_v18 = vrot.slane %v600_v6, %v1916_v9  ;;  %v401_v20 = vadd.f32 %v1372_v17, %v1910_v0  ;;  %v673_v5 = vcombine.high %v663_v56, %v663_v56  ;;  %v642_v6 = vcombine.high %v640_v58, %v640_v58  ;;  %v1952_v17 = vld [vmem:[%s2213_s2 + $0x88] ss:$0 sm:$0xff] }
 0x111   : > { %v682_v21 = vrot.slane %v614_v15, %v1916_v9  ;;  %v624_v22 = vcombine.high %v614_v15, %v614_v15  ;;  %v686_v23 = vrot.slane %v622_v16, %v1916_v9  ;;  %v621_v24 = vrot.slane %v593_v13, %v1905_v61  ;;  %v395_v25 = vpop.f32.mrf.mxu0 }
 0x112   : > { %v755_v26 = vadd.f32 %v678_v18, %v376_v12  ;;  %v396_v27 = vadd.f32 %v1910_v0, %v395_v25  ;;  %v694_v28 = vrot.slane %v607_v14, %v1916_v9  ;;  %v623_v29 = vcombine.high %v607_v14, %v607_v14 }
 0x113   : > { %v756_v30 = vadd.f32 %v682_v21, %v381_v10  ;;  %v690_v31 = vrot.slane %v624_v22, %v1916_v9  ;;  %v757_v32 = vadd.f32 %v686_v23, %v386_v8  ;;  %v698_v33 = vrot.slane %v621_v24, %v1916_v9  ;;  %v1375_v34 = vpop.f32.mrf.mxu0 }
 0x114   : > { %1459 = vtanh.f32 %v755_v26  ;;  %v625_v36 = vcombine.high %v621_v24, %v621_v24  ;;  %v759_v40 = vadd.f32 %v694_v28, %v396_v27  ;;  %v702_v51 = vrot.slane %v623_v29, %v1916_v9 }
 0x115   : > { %1461 = vtanh.f32 %v756_v30  ;;  %v758_v39 = vadd.f32 %v690_v31, %v391_v19  ;;  %v405_v48 = vpop.f32.mrf.mxu0  ;;  %v760_v52 = vadd.f32 %v698_v33, %v401_v20  ;;  %v411_v53 = vadd.f32 %v1375_v34, %v1910_v0 }
 0x116   : > { %1463 = vtanh.f32 %v757_v32  ;;  %v406_v50 = vadd.f32 %v1910_v0, %v405_v48  ;;  %v706_v54 = vrot.slane %v625_v36, %v1916_v9  ;;  %v714_v10 = vrot.slane %v663_v56, %v1916_v9 }
 0x117   : > { %1465 = vtanh.f32 %v758_v39  ;;  %v1378_v55 = vpop.f32.mrf.mxu0  ;;  %v718_v14 = vrot.slane %v671_v60, %v1916_v9  ;;  %v722_v18 = vrot.slane %v673_v5, %v1916_v9  ;;  %v670_v20 = vrot.slane %v642_v6, %v1905_v61 }
 0x118   : > { %v761_v57 = vadd.f32 %v702_v51, %v406_v50  ;;  %1467 = vtanh.f32 %v759_v40  ;;  %v762_v1 = vadd.f32 %v706_v54, %v411_v53  ;;  %v421_v2 = vadd.f32 %v1378_v55, %v1910_v0 }
 0x119   : > { %v415_v59 = vpop.f32.mrf.mxu0  ;;  %1469 = vtanh.f32 %v760_v52  ;;  %v726_v22 = vrot.slane %v656_v7, %v1916_v9  ;;  %v672_v27 = vcombine.high %v656_v7, %v656_v7  ;;  %v730_v34 = vrot.slane %v670_v20, %v1916_v9 }
 0x11a   : > { %v416_v62 = vadd.f32 %v1910_v0, %v415_v59  ;;  %1471 = vtanh.f32 %v761_v57  ;;  %v764_v15 = vadd.f32 %v714_v10, %v421_v2  ;;  %v674_v35 = vcombine.high %v670_v20, %v670_v20 }
 0x11b   : > { %v1381_v3 = vpop.f32.mrf.mxu0  ;;  %1473 = vtanh.f32 %v762_v1  ;;  %v734_v48 = vrot.slane %v672_v27, %v1916_v9 }
 0x11c   : > { %v763_v4 = vadd.f32 %v710_v63, %v416_v62  ;;  %v431_v12 = vadd.f32 %v1381_v3, %v1910_v0  ;;  %v738_v58 = vrot.slane %v674_v35, %v1916_v9 }
 0x11d   : > { %v425_v11 = vpop.f32.mrf.mxu0 }
 0x11e   : > { %v426_v13 = vadd.f32 %v1910_v0, %v425_v11  ;;  %1475 = vtanh.f32 %v763_v4  ;;  %v766_v24 = vadd.f32 %v722_v18, %v431_v12 }
 0x11f   : > { %v1384_v16 = vpop.f32.mrf.mxu0  ;;  %1477 = vtanh.f32 %v764_v15 }
 0x120   : > { %v765_v19 = vadd.f32 %v718_v14, %v426_v13  ;;  %v441_v29 = vadd.f32 %v1384_v16, %v1910_v0 }
 0x121   : > { %v1460_v8 = vpop.eup %1459  ;;  %v435_v21 = vpop.f32.mrf.mxu0 }
 0x122   : > { %v1462_v23 = vpop.eup %1461  ;;  %v436_v25 = vadd.f32 %v1910_v0, %v435_v21  ;;  %v791_v26 = vmul.f32 %v1460_v8, %v1952_v17  ;;  %1479 = vtanh.f32 %v765_v19  ;;  %v768_v49 = vadd.f32 %v730_v34, %v441_v29 }
 0x123   : > { %v1464_v28 = vpop.eup %1463  ;;  %v1387_v30 = vpop.f32.mrf.mxu0  ;;  %v792_v33 = vmul.f32 %v1462_v23, %v1952_v17  ;;  %1481 = vtanh.f32 %v766_v24 }
 0x124   : > { %v1466_v31 = vpop.eup %1465  ;;  %v767_v32 = vadd.f32 %v726_v22, %v436_v25  ;;  %v807_v61 = vsel %vm260_vm0, %v791_v26, 0.0  ;;  %v793_v37 = vmul.f32 %v1464_v28, %v1952_v17  ;;  %v451_v50 = vadd.f32 %v1387_v30, %v1910_v0 }
 0x125   : > { %808 = vadd.xlane.f32.xlu0 %v807_v61  ;;  %v445_v36 = vpop.f32.mrf.mxu0  ;;  %v1468_v39 = vpop.eup %1467  ;;  %v794_v52 = vmul.f32 %v1466_v31, %v1952_v17  ;;  %v810_v55 = vsel %vm260_vm0, %v792_v33, 0.0 }
 0x126   : > { %v446_v40 = vadd.f32 %v1910_v0, %v445_v36  ;;  %v813_v51 = vsel %vm260_vm0, %v793_v37, 0.0  ;;  %v1470_v53 = vpop.eup %1469  ;;  %1483 = vtanh.f32 %v767_v32  ;;  %v795_v56 = vmul.f32 %v1468_v39, %v1952_v17 }
 0x127   : > { %814 = vadd.xlane.f32.xlu1 %v813_v51  ;;  %v1472_v57 = vpop.eup %1471  ;;  %1485 = vtanh.f32 %v768_v49  ;;  %v770_v59 = vadd.f32 %v738_v58, %v451_v50  ;;  %v816_v0 = vsel %vm260_vm0, %v794_v52, 0.0  ;;  %v796_v60 = vmul.f32 %v1470_v53, %v1952_v17 }
 0x128   : > { %v769_v54 = vadd.f32 %v734_v48, %v446_v40  ;;  %v1474_v62 = vpop.eup %1473  ;;  %v819_v63 = vsel %vm260_vm0, %v795_v56, 0.0  ;;  %v797_v1 = vmul.f32 %v1472_v57, %v1952_v17 }
 0x129   : > { %811 = vadd.xlane.f32.xlu0 %v810_v55  ;;  %v822_v3 = vsel %vm260_vm0, %v796_v60, 0.0  ;;  %v798_v9 = vmul.f32 %v1474_v62, %v1952_v17 }
 0x12a   : > { %1487 = vtanh.f32 %v769_v54  ;;  %v825_v5 = vsel %vm260_vm0, %v797_v1, 0.0 }
 0x12b   : > { %817 = vadd.xlane.f32.xlu1 %v816_v0  ;;  %v1476_v2 = vpop.eup %1475  ;;  %1489 = vtanh.f32 %v770_v59  ;;  %v828_v11 = vsel %vm260_vm0, %v798_v9, 0.0 }
 0x12c   : > { %v1478_v4 = vpop.eup %1477  ;;  %v799_v6 = vmul.f32 %v1476_v2, %v1952_v17 }
 0x12d   : > { %820 = vadd.xlane.f32.xlu0 %v819_v63  ;;  %v800_v12 = vmul.f32 %v1478_v4, %v1952_v17 }
 0x12e   : > { %v831_v13 = vsel %vm260_vm0, %v799_v6, 0.0 }
 0x12f   : > { %823 = vadd.xlane.f32.xlu1 %v822_v3  ;;  %v1480_v7 = vpop.eup %1479  ;;  %v834_v16 = vsel %vm260_vm0, %v800_v12, 0.0 }
 0x130   : > { %v1482_v10 = vpop.eup %1481  ;;  %v801_v14 = vmul.f32 %v1480_v7, %v1952_v17 }
 0x131   : > { %826 = vadd.xlane.f32.xlu0 %v825_v5  ;;  %v802_v18 = vmul.f32 %v1482_v10, %v1952_v17 }
 0x132   : > { %v837_v8 = vsel %vm260_vm0, %v801_v14, 0.0 }
 0x133   : > { %829 = vadd.xlane.f32.xlu1 %v828_v11  ;;  %v1484_v15 = vpop.eup %1483  ;;  %v840_v22 = vsel %vm260_vm0, %v802_v18, 0.0 }
 0x134   : > { %v1486_v19 = vpop.eup %1485  ;;  %v803_v20 = vmul.f32 %v1484_v15, %v1952_v17 }
 0x135   : > { %832 = vadd.xlane.f32.xlu0 %v831_v13  ;;  %v804_v23 = vmul.f32 %v1486_v19, %v1952_v17 }
 0x136   : > { %v843_v25 = vsel %vm260_vm0, %v803_v20, 0.0 }
 0x137   : > { %835 = vadd.xlane.f32.xlu1 %v834_v16  ;;  %v1488_v21 = vpop.eup %1487  ;;  %v846_v27 = vsel %vm260_vm0, %v804_v23, 0.0 }
 0x138   : > { %v1490_v24 = vpop.eup %1489  ;;  %v805_v26 = vmul.f32 %v1488_v21, %v1952_v17 }
 0x139   : > { %838 = vadd.xlane.f32.xlu0 %v837_v8  ;;  %v806_v28 = vmul.f32 %v1490_v24, %v1952_v17 }
 0x13a   : > { %v849_v29 = vsel %vm260_vm0, %v805_v26, 0.0 }
 0x13b   : > { %841 = vadd.xlane.f32.xlu1 %v840_v22  ;;  %v852_v30 = vsel %vm260_vm0, %v806_v28, 0.0 }
 0x13d   : > { %844 = vadd.xlane.f32.xlu0 %v843_v25 }
 0x13f   : > { %847 = vadd.xlane.f32.xlu1 %v846_v27 }
 0x141   : > { %850 = vadd.xlane.f32.xlu0 %v849_v29 }
 0x143   : > { %853 = vadd.xlane.f32.xlu1 %v852_v30 }
 0x1ae   : > { %v809_v31 = vpop.xlane.xlu0 %808 }
 0x1af   : > { %v855_v32 = vrot.slane %v809_v31, 4 }
 0x1b0   : > { %v815_v33 = vpop.xlane.xlu1 %814 }
 0x1b1   : > { %v856_v61 = vmax.f32 %v809_v31, %v855_v32  ;;  %v867_v34 = vrot.slane %v815_v33, 4 }
 0x1b2   : > { %v812_v35 = vpop.xlane.xlu0 %811 }
 0x1b3   : > { %v857_v36 = vrot.slane %v856_v61, 2  ;;  %v861_v37 = vrot.slane %v812_v35, 4  ;;  %v868_v39 = vmax.f32 %v815_v33, %v867_v34 }
 0x1b4   : > { %v818_v49 = vpop.xlane.xlu1 %817 }
 0x1b5   : > { %v858_v40 = vmax.f32 %v856_v61, %v857_v36  ;;  %v862_v48 = vmax.f32 %v812_v35, %v861_v37  ;;  %v869_v17 = vrot.slane %v868_v39, 2  ;;  %v873_v50 = vrot.slane %v818_v49, 4 }
 0x1b6   : > { %v821_v51 = vpop.xlane.xlu0 %820 }
 0x1b7   : > { %v859_v52 = vrot.slane %v858_v40, 1  ;;  %v863_v53 = vrot.slane %v862_v48, 2  ;;  %v879_v54 = vrot.slane %v821_v51, 4  ;;  %v870_v55 = vmax.f32 %v868_v39, %v869_v17 }
 0x1b8   : > { %v874_v56 = vmax.f32 %v818_v49, %v873_v50  ;;  %v824_v0 = vpop.xlane.xlu1 %823 }
 0x1b9   : > { %v860_v57 = vmax.f32 %v858_v40, %v859_v52  ;;  %v864_v58 = vmax.f32 %v862_v48, %v863_v53  ;;  %v880_v59 = vmax.f32 %v821_v51, %v879_v54  ;;  %v871_v60 = vrot.slane %v870_v55, 1 }
 0x1ba   : > { %v875_v62 = vrot.slane %v874_v56, 2  ;;  %v885_v63 = vrot.slane %v824_v0, 4  ;;  %v827_v1 = vpop.xlane.xlu0 %826 }
 0x1bb   : > { %v951_v2 = vsub.f32 %v809_v31, %v860_v57  ;;  %v865_v3 = vrot.slane %v864_v58, 1  ;;  %v881_v9 = vrot.slane %v880_v59, 2  ;;  %v891_v4 = vrot.slane %v827_v1, 4 }
 0x1bc   : > { %v872_v5 = vmax.f32 %v870_v55, %v871_v60  ;;  %v876_v6 = vmax.f32 %v874_v56, %v875_v62  ;;  %v886_v7 = vmax.f32 %v824_v0, %v885_v63  ;;  %v1996_v14 = vpop.xlane.xlu1 %829 }
 0x1bd   : > { %v967_v10 = vmul.f32 1.442695, %v951_v2  ;;  %v866_v11 = vmax.f32 %v864_v58, %v865_v3  ;;  %v882_v12 = vmax.f32 %v880_v59, %v881_v9  ;;  %v892_v13 = vmax.f32 %v827_v1, %v891_v4 }
 0x1be   : > { %v953_v15 = vsub.f32 %v815_v33, %v872_v5  ;;  %v877_v16 = vrot.slane %v876_v6, 1  ;;  %v887_v18 = vrot.slane %v886_v7, 2  ;;  %v897_v19 = vrot.slane %v1996_v14, 4  ;;  %v1999_v8 = vpop.xlane.xlu0 %832 }
 0x1bf   : > { %1491 = vpow2.f32 %v967_v10  ;;  %v952_v20 = vsub.f32 %v812_v35, %v866_v11  ;;  %v883_v21 = vrot.slane %v882_v12, 1  ;;  %v893_v22 = vrot.slane %v892_v13, 2 }
 0x1c0   : > { %v971_v23 = vmul.f32 1.442695, %v953_v15  ;;  %v878_v24 = vmax.f32 %v876_v6, %v877_v16  ;;  %v888_v25 = vmax.f32 %v886_v7, %v887_v18  ;;  %v898_v26 = vmax.f32 %v1996_v14, %v897_v19  ;;  %v2003_v31 = vpop.xlane.xlu1 %835 }
 0x1c1   : > { %v969_v27 = vmul.f32 1.442695, %v952_v20  ;;  %v884_v28 = vmax.f32 %v882_v12, %v883_v21  ;;  %v894_v29 = vmax.f32 %v892_v13, %v893_v22  ;;  %v903_v30 = vrot.slane %v1999_v8, 4 }
 0x1c2   : > { %1493 = vpow2.f32 %v971_v23  ;;  %v954_v32 = vsub.f32 %v818_v49, %v878_v24  ;;  %v889_v61 = vrot.slane %v888_v25, 1  ;;  %v899_v33 = vrot.slane %v898_v26, 2  ;;  %v2005_v34 = vpop.xlane.xlu0 %838 }
 0x1c3   : > { %1495 = vpow2.f32 %v969_v27  ;;  %v955_v35 = vsub.f32 %v821_v51, %v884_v28  ;;  %v895_v36 = vrot.slane %v894_v29, 1  ;;  %v904_v37 = vmax.f32 %v1999_v8, %v903_v30 }
 0x1c4   : > { %v973_v39 = vmul.f32 1.442695, %v954_v32  ;;  %v890_v40 = vmax.f32 %v888_v25, %v889_v61  ;;  %v900_v48 = vmax.f32 %v898_v26, %v899_v33  ;;  %v909_v17 = vrot.slane %v2003_v31, 4  ;;  %v2010_v49 = vpop.xlane.xlu1 %841 }
 0x1c5   : > { %v975_v50 = vmul.f32 1.442695, %v955_v35  ;;  %v896_v52 = vmax.f32 %v894_v29, %v895_v36  ;;  %v905_v53 = vrot.slane %v904_v37, 2  ;;  %v915_v54 = vrot.slane %v2005_v34, 4 }
 0x1c6   : > { %1497 = vpow2.f32 %v973_v39  ;;  %v956_v55 = vsub.f32 %v824_v0, %v890_v40  ;;  %v901_v56 = vrot.slane %v900_v48, 1  ;;  %v910_v51 = vmax.f32 %v2003_v31, %v909_v17  ;;  %v2013_v57 = vpop.xlane.xlu0 %844 }
 0x1c7   : > { %1499 = vpow2.f32 %v975_v50  ;;  %v957_v58 = vsub.f32 %v827_v1, %v896_v52  ;;  %v906_v59 = vmax.f32 %v904_v37, %v905_v53  ;;  %v916_v60 = vmax.f32 %v2005_v34, %v915_v54 }
 0x1c8   : > { %v977_v62 = vmul.f32 1.442695, %v956_v55  ;;  %v902_v63 = vmax.f32 %v900_v48, %v901_v56  ;;  %v911_v2 = vrot.slane %v910_v51, 2  ;;  %v921_v3 = vrot.slane %v2010_v49, 4  ;;  %v2018_v6 = vpop.xlane.xlu1 %847 }
 0x1c9   : > { %v979_v9 = vmul.f32 1.442695, %v957_v58  ;;  %v907_v4 = vrot.slane %v906_v59, 1  ;;  %v917_v5 = vrot.slane %v916_v60, 2  ;;  %v927_v0 = vrot.slane %v2013_v57, 4 }
 0x1ca   : > { %1501 = vpow2.f32 %v977_v62  ;;  %v958_v7 = vsub.f32 %v1996_v14, %v902_v63  ;;  %v912_v10 = vmax.f32 %v910_v51, %v911_v2  ;;  %v922_v1 = vmax.f32 %v2010_v49, %v921_v3 }
 0x1cb   : > { %1503 = vpow2.f32 %v979_v9  ;;  %v908_v11 = vmax.f32 %v906_v59, %v907_v4  ;;  %v918_v12 = vmax.f32 %v916_v60, %v917_v5  ;;  %v928_v13 = vmax.f32 %v2013_v57, %v927_v0 }
 0x1cc   : > { %v2023_v15 = vpop.eup %1491  ;;  %v981_v16 = vmul.f32 1.442695, %v958_v7  ;;  %v913_v18 = vrot.slane %v912_v10, 1  ;;  %v923_v19 = vrot.slane %v922_v1, 2  ;;  %v933_v20 = vrot.slane %v2018_v6, 4 }
 0x1cd   : > { %v999_v21 = vrot.slane %v2023_v15, 4  ;;  %v959_v22 = vsub.f32 %v1999_v8, %v908_v11  ;;  %v919_v14 = vrot.slane %v918_v12, 1  ;;  %v929_v23 = vrot.slane %v928_v13, 2 }
 0x1ce   : > { %1505 = vpow2.f32 %v981_v16  ;;  %v914_v24 = vmax.f32 %v912_v10, %v913_v18  ;;  %v924_v25 = vmax.f32 %v922_v1, %v923_v19  ;;  %v934_v26 = vmax.f32 %v2018_v6, %v933_v20 }
 0x1cf   : > { %v2029_v27 = vpop.eup %1493  ;;  %v1000_v28 = vadd.f32 %v2023_v15, %v999_v21  ;;  %v983_v29 = vmul.f32 1.442695, %v959_v22  ;;  %v920_v30 = vmax.f32 %v918_v12, %v919_v14  ;;  %v930_v32 = vmax.f32 %v928_v13, %v929_v23 }
 0x1d0   : > { %v2032_v61 = vpop.eup %1495  ;;  %v1011_v33 = vrot.slane %v2029_v27, 4  ;;  %v960_v8 = vsub.f32 %v2003_v31, %v914_v24  ;;  %v925_v35 = vrot.slane %v924_v25, 1  ;;  %v935_v36 = vrot.slane %v934_v26, 2 }
 0x1d1   : > { %v1001_v37 = vrot.slane %v1000_v28, 2  ;;  %v1005_v39 = vrot.slane %v2032_v61, 4  ;;  %1507 = vpow2.f32 %v983_v29  ;;  %v961_v40 = vsub.f32 %v2005_v34, %v920_v30 }
 0x1d2   : > { %v1012_v48 = vadd.f32 %v2029_v27, %v1011_v33  ;;  %v985_v17 = vmul.f32 1.442695, %v960_v8  ;;  %v926_v50 = vmax.f32 %v924_v25, %v925_v35  ;;  %v931_v52 = vrot.slane %v930_v32, 1 }
 0x1d3   : > { %v2039_v53 = vpop.eup %1497  ;;  %v1002_v54 = vadd.f32 %v1001_v37, %v1000_v28  ;;  %v1006_v55 = vadd.f32 %v2032_v61, %v1005_v39  ;;  %v987_v56 = vmul.f32 1.442695, %v961_v40  ;;  %v936_v31 = vmax.f32 %v934_v26, %v935_v36 }
 0x1d4   : > { %v2042_v51 = vpop.eup %1499  ;;  %v1013_v58 = vrot.slane %v1012_v48, 2  ;;  %v1017_v59 = vrot.slane %v2039_v53, 4  ;;  %1509 = vpow2.f32 %v985_v17  ;;  %v962_v34 = vsub.f32 %v2010_v49, %v926_v50 }
 0x1d5   : > { %v1003_v60 = vrot.slane %v1002_v54, 1  ;;  %v1007_v62 = vrot.slane %v1006_v55, 2  ;;  %v1023_v63 = vrot.slane %v2042_v51, 4  ;;  %1511 = vpow2.f32 %v987_v56 }
 0x1d6   : > { %v1014_v2 = vadd.f32 %v1013_v58, %v1012_v48  ;;  %v1018_v3 = vadd.f32 %v2039_v53, %v1017_v59  ;;  %v989_v9 = vmul.f32 1.442695, %v962_v34  ;;  %v932_v4 = vmax.f32 %v930_v32, %v931_v52  ;;  %v2065_v48 = vpop.xlane.xlu0 %850 }
 0x1d7   : > { %v2048_v5 = vpop.eup %1501  ;;  %v1004_v0 = vadd.f32 %v1003_v60, %v1002_v54  ;;  %v1008_v7 = vadd.f32 %v1007_v62, %v1006_v55  ;;  %v1024_v10 = vadd.f32 %v2042_v51, %v1023_v63  ;;  %v937_v1 = vrot.slane %v936_v31, 1 }
 0x1d8   : > { %v2051_v11 = vpop.eup %1503  ;;  %v1015_v49 = vrot.slane %v1014_v2, 1  ;;  %v1019_v12 = vrot.slane %v1018_v3, 2  ;;  %v1029_v13 = vrot.slane %v2048_v5, 4  ;;  %1513 = vpow2.f32 %v989_v9 }
 0x1d9   : > { %1515 = vrcp.f32 %v1004_v0  ;;  %v1009_v16 = vrot.slane %v1008_v7, 1  ;;  %v1025_v18 = vrot.slane %v1024_v10, 2  ;;  %v1035_v19 = vrot.slane %v2051_v11, 4 }
 0x1da   : > { %v1016_v20 = vadd.f32 %v1015_v49, %v1014_v2  ;;  %v1020_v21 = vadd.f32 %v1019_v12, %v1018_v3  ;;  %v1030_v22 = vadd.f32 %v2048_v5, %v1029_v13  ;;  %v963_v14 = vsub.f32 %v2013_v57, %v932_v4 }
 0x1db   : > { %v2057_v23 = vpop.eup %1505  ;;  %v1010_v24 = vadd.f32 %v1009_v16, %v1008_v7  ;;  %v1026_v25 = vadd.f32 %v1025_v18, %v1024_v10  ;;  %v1036_v26 = vadd.f32 %v2051_v11, %v1035_v19  ;;  %v938_v28 = vmax.f32 %v936_v31, %v937_v1 }
 0x1dc   : > { %1517 = vrcp.f32 %v1016_v20  ;;  %v1021_v29 = vrot.slane %v1020_v21, 1  ;;  %v1031_v30 = vrot.slane %v1030_v22, 2  ;;  %v1041_v32 = vrot.slane %v2057_v23, 4 }
 0x1dd   : > { %1519 = vrcp.f32 %v1010_v24  ;;  %v1027_v33 = vrot.slane %v1026_v25, 1  ;;  %v1037_v8 = vrot.slane %v1036_v26, 2  ;;  %v991_v35 = vmul.f32 1.442695, %v963_v14 }
 0x1de   : > { %v2061_v36 = vpop.eup %1507  ;;  %v1022_v37 = vadd.f32 %v1021_v29, %v1020_v21  ;;  %v1032_v57 = vadd.f32 %v1031_v30, %v1030_v22  ;;  %v1042_v39 = vadd.f32 %v2057_v23, %v1041_v32  ;;  %v964_v40 = vsub.f32 %v2018_v6, %v938_v28  ;;  %v2072_v6 = vpop.xlane.xlu1 %853 }
 0x1df   : > { %v1028_v17 = vadd.f32 %v1027_v33, %v1026_v25  ;;  %v1038_v50 = vadd.f32 %v1037_v8, %v1036_v26  ;;  %v1047_v52 = vrot.slane %v2061_v36, 4  ;;  %1521 = vpow2.f32 %v991_v35 }
 0x1e0   : > { %1523 = vrcp.f32 %v1022_v37  ;;  %v1033_v54 = vrot.slane %v1032_v57, 1  ;;  %v1043_v55 = vrot.slane %v1042_v39, 2  ;;  %v993_v56 = vmul.f32 1.442695, %v964_v40 }
 0x1e1   : > { %v2068_v31 = vpop.eup %1509  ;;  %1525 = vrcp.f32 %v1028_v17  ;;  %v1039_v58 = vrot.slane %v1038_v50, 1  ;;  %v1048_v59 = vadd.f32 %v2061_v36, %v1047_v52  ;;  %v939_v34 = vrot.slane %v2065_v48, 4 }
 0x1e2   : > { %v2074_v60 = vpop.eup %1511  ;;  %v1034_v62 = vadd.f32 %v1033_v54, %v1032_v57  ;;  %v1044_v63 = vadd.f32 %v1043_v55, %v1042_v39  ;;  %v1053_v2 = vrot.slane %v2068_v31, 4  ;;  %1527 = vpow2.f32 %v993_v56 }
 0x1e3   : > { %v1040_v3 = vadd.f32 %v1039_v58, %v1038_v50  ;;  %v1049_v9 = vrot.slane %v1048_v59, 2  ;;  %v1059_v4 = vrot.slane %v2074_v60, 4  ;;  %v940_v0 = vmax.f32 %v2065_v48, %v939_v34 }
 0x1e4   : > { %1529 = vrcp.f32 %v1034_v62  ;;  %v1045_v7 = vrot.slane %v1044_v63, 1  ;;  %v1054_v10 = vadd.f32 %v2068_v31, %v1053_v2  ;;  %v945_v1 = vrot.slane %v2072_v6, 4 }
 0x1e5   : > { %v2081_v49 = vpop.eup %1513  ;;  %1531 = vrcp.f32 %v1040_v3  ;;  %v1050_v12 = vadd.f32 %v1049_v9, %v1048_v59  ;;  %v1060_v13 = vadd.f32 %v2074_v60, %v1059_v4  ;;  %v941_v16 = vrot.slane %v940_v0, 2 }
 0x1e6   : > { %v1516_v18 = vpop.eup %1515  ;;  %v1046_v19 = vadd.f32 %v1045_v7, %v1044_v63  ;;  %v1055_v20 = vrot.slane %v1054_v10, 2  ;;  %v1065_v21 = vrot.slane %v2081_v49, 4  ;;  %v946_v22 = vmax.f32 %v2072_v6, %v945_v1 }
 0x1e7   : > { %v1111_v14 = vmul.f32 %v1516_v18, %v2023_v15  ;;  %v1051_v24 = vrot.slane %v1050_v12, 1  ;;  %v1061_v25 = vrot.slane %v1060_v13, 2  ;;  %v942_v26 = vmax.f32 %v940_v0, %v941_v16 }
 0x1e8   : > { %1533 = vrcp.f32 %v1046_v19  ;;  %v1056_v28 = vadd.f32 %v1055_v20, %v1054_v10  ;;  %v1066_v29 = vadd.f32 %v2081_v49, %v1065_v21  ;;  %v947_v30 = vrot.slane %v946_v22, 2 }
 0x1e9   : > { %v1518_v32 = vpop.eup %1517  ;;  %v1127_v33 = vmul.f32 %v1111_v14, %v1847_v38  ;;  %v1052_v8 = vadd.f32 %v1051_v24, %v1050_v12  ;;  %v1062_v35 = vadd.f32 %v1061_v25, %v1060_v13  ;;  %v943_v37 = vrot.slane %v942_v26, 1 }
 0x1ea   : > { %v1520_v57 = vpop.eup %1519  ;;  %v1113_v39 = vmul.f32 %v1518_v32, %v2029_v27  ;;  %v1057_v40 = vrot.slane %v1056_v28, 1  ;;  %v1067_v15 = vrot.slane %v1066_v29, 2  ;;  %v948_v17 = vmax.f32 %v946_v22, %v947_v30 }
 0x1eb   : > { %v1143_v50 = vsel %vm260_vm0, %v1127_v33, 0.0  ;;  %v1112_v52 = vmul.f32 %v1520_v57, %v2032_v61  ;;  %1535 = vrcp.f32 %v1052_v8  ;;  %v1063_v54 = vrot.slane %v1062_v35, 1 }
 0x1ec   : > { %v2092_v55 = vpop.eup %1521  ;;  %v1129_v38 = vmul.f32 %v1113_v39, %v1855_v42  ;;  %v1058_v56 = vadd.f32 %v1057_v40, %v1056_v28  ;;  %v1068_v58 = vadd.f32 %v1067_v15, %v1066_v29  ;;  %v944_v59 = vmax.f32 %v942_v26, %v943_v37 }
 0x1ed   : > { %v1524_v34 = vpop.eup %1523  ;;  %v1128_v27 = vmul.f32 %v1112_v52, %v1850_v41  ;;  %v1064_v62 = vadd.f32 %v1063_v54, %v1062_v35  ;;  %v1071_v63 = vrot.slane %v2092_v55, 4  ;;  %v949_v2 = vrot.slane %v948_v17, 1 }
 0x1ee   : > { %v1526_v3 = vpop.eup %1525  ;;  %v1146_v61 = vsel %vm260_vm0, %v1129_v38, 0.0  ;;  %v1114_v9 = vmul.f32 %v1524_v34, %v2039_v53  ;;  %1537 = vrcp.f32 %v1058_v56  ;;  %v1069_v4 = vrot.slane %v1068_v58, 1  ;;  %v1556_v56 = vld [vmem:[%s1785_s11 + $0x48] sm:$0xff] }
 0x1ef   : > { %v2100_v0 = vpop.eup %1527  ;;  %v1144_v42 = vsel %vm260_vm0, %v1128_v27, 0.0  ;;  %v1115_v7 = vmul.f32 %v1526_v3, %v2042_v51  ;;  %1539 = vrcp.f32 %v1064_v62  ;;  %v1072_v41 = vadd.f32 %v2092_v55, %v1071_v63  ;;  %v1557_v62 = vld [vmem:[%s1785_s11 + $0x50] sm:$0xff] }
 0x1f0   : > { %v1145_v10 = vadd.f32 %v1144_v42, %v1143_v50  ;;  %v1130_v1 = vmul.f32 %v1114_v9, %v1864_v43  ;;  %v1070_v12 = vadd.f32 %v1069_v4, %v1068_v58  ;;  %v1077_v13 = vrot.slane %v2100_v0, 4 }
 0x1f1   : > { %v1530_v16 = vpop.eup %1529  ;;  %v1131_v53 = vmul.f32 %v1115_v7, %v1867_v44  ;;  %v1073_v18 = vrot.slane %v1072_v41, 2  ;;  %v965_v19 = vsub.f32 %v2065_v48, %v944_v59  ;;  %v950_v20 = vmax.f32 %v948_v17, %v949_v2 }
 0x1f2   : > { %v1532_v21 = vpop.eup %1531  ;;  %v1147_v22 = vsel %vm260_vm0, %v1130_v1, 0.0  ;;  %v1116_v51 = vmul.f32 %v1530_v16, %v2048_v5  ;;  %1541 = vrcp.f32 %v1070_v12  ;;  %v1078_v14 = vadd.f32 %v2100_v0, %v1077_v13  ;;  %1167 = vst.msk [vmem:[%s2112_s27] sm:$0xff] %vm260_vm0, %v1145_v10 }
 0x1f3   : > { %v1148_v43 = vadd.f32 %v1147_v22, %v1146_v61  ;;  %v1117_v44 = vmul.f32 %v1532_v21, %v2051_v11  ;;  %v1074_v24 = vadd.f32 %v1073_v18, %v1072_v41  ;;  %v995_v26 = vmul.f32 1.442695, %v965_v19  ;;  %v1560_v22 = vld [vmem:[%s1785_s11 + $0x68] sm:$0xff] }
 0x1f4   : > { %v1132_v48 = vmul.f32 %v1116_v51, %v1874_v45  ;;  %v1079_v25 = vrot.slane %v1078_v14, 2  ;;  %v966_v28 = vsub.f32 %v2072_v6, %v950_v20  ;;  %v1149_v29 = vsel %vm260_vm0, %v1131_v53, 0.0  ;;  %v1559_v53 = vld [vmem:[%s1785_s11 + $0x60] sm:$0xff] }
 0x1f5   : > { %v1534_v5 = vpop.eup %1533  ;;  %v1133_v30 = vmul.f32 %v1117_v44, %v1877_v46  ;;  %v1075_v32 = vrot.slane %v1074_v24, 1  ;;  %1168 = vst.msk [vmem:[%s2112_s27 + $0x8] sm:$0xff] %vm260_vm0, %v1148_v43  ;;  %1543 = vpow2.f32 %v995_v26 }
 0x1f6   : > { %v1150_v33 = vsel %vm260_vm0, %v1132_v48, 0.0  ;;  %v1118_v11 = vmul.f32 %v1534_v5, %v2057_v23  ;;  %v1080_v8 = vadd.f32 %v1079_v25, %v1078_v14  ;;  %v997_v37 = vmul.f32 1.442695, %v966_v28 }
 0x1f7   : > { %v1151_v45 = vadd.f32 %v1150_v33, %v1149_v29  ;;  %v1076_v35 = vadd.f32 %v1075_v32, %v1074_v24  ;;  %v1152_v40 = vsel %vm260_vm0, %v1133_v30, 0.0  ;;  %v1561_v30 = vld [vmem:[%s1785_s11 + $0x70] sm:$0xff] }
 0x1f8   : > { %v1536_v6 = vpop.eup %1535  ;;  %v1134_v57 = vmul.f32 %v1118_v11, %v1884_v47  ;;  %v1081_v39 = vrot.slane %v1080_v8, 1  ;;  %v1555_v47 = vld [vmem:[%s1785_s11 + $0x40] sm:$0xff]  ;;  %v1562_v11 = vld [vmem:[%s1785_s11 + $0x78] sm:$0xff] }
 0x1f9   : > { %v1119_v46 = vmul.f32 %v1536_v6, %v2061_v36  ;;  %1545 = vrcp.f32 %v1076_v35  ;;  %1169 = vst.msk [vmem:[%s2112_s27 + $0x10] sm:$0xff] %vm260_vm0, %v1151_v45 }
 0x1fa   : > { %v1153_v23 = vsel %vm260_vm0, %v1134_v57, 0.0  ;;  %v1082_v15 = vadd.f32 %v1081_v39, %v1080_v8  ;;  %1547 = vpow2.f32 %v997_v37 }
 0x1fb   : > { %v1538_v17 = vpop.eup %1537  ;;  %v1154_v50 = vadd.f32 %v1153_v23, %v1152_v40  ;;  %v1135_v54 = vmul.f32 %v1555_v47, %v1119_v46 }
 0x1fc   : > { %v1540_v52 = vpop.eup %1539  ;;  %v1120_v38 = vmul.f32 %v1538_v17, %v2068_v31  ;;  %1549 = vrcp.f32 %v1082_v15  ;;  %v1558_v31 = vld [vmem:[%s1785_s11 + $0x58] sm:$0xff]  ;;  %s1591_s11 = scalar_lea.vmem %s2167_s29, 1024 }
 0x1fd   : > { %v1121_v36 = vmul.f32 %v1540_v52, %v2074_v60  ;;  %1170 = vst.msk [vmem:[%s2112_s27 + $0x18] sm:$0xff] %vm260_vm0, %v1154_v50  ;;  %v1155_v34 = vsel %vm260_vm0, %v1135_v54, 0.0  ;;  %p1592_p11 = scmp.ne.s32.totalorder %s2167_s29, %s1591_s11  ;;  %p1599_p8 = scmp.lt.s32.totalorder %s1597_s8, %s1591_s11 }
 0x1fe   : > { %v1136_v58 = vmul.f32 %v1556_v56, %v1120_v38 }
 0x1ff   : > { %v1542_v59 = vpop.eup %1541  ;;  %v1137_v63 = vmul.f32 %v1557_v62, %v1121_v36  ;;  %p1593_p4 = pnand %p1592_p11, %p2223_p12  ;;  %p1600_p9 = por %p1599_p8, %p1598_p7 }
 0x200   : > { %v1156_v27 = vsel %vm260_vm0, %v1136_v58, 0.0  ;;  %v1122_v2 = vmul.f32 %v1542_v59, %v2081_v49 }
 0x201   : > { %v1157_v3 = vadd.f32 %v1156_v27, %v1155_v34  ;;  %v1158_v60 = vsel %vm260_vm0, %v1137_v63, 0.0  ;;  %p1594_p5 = pneg %p1593_p4 }
 0x202   : > { %v1138_v61 = vmul.f32 %v1558_v31, %v1122_v2  ;;  %v1544_v9 = vpop.eup %1543 }
 0x203   : > { %1171 = vst.msk [vmem:[%s2112_s27 + $0x20] sm:$0xff] %vm260_vm0, %v1157_v3  ;;  %v1083_v42 = vrot.slane %v1544_v9, 4  ;;  %p1601_p13 = pnand %p1600_p9, %p1594_p5 }
 0x204   : > { %v1159_v4 = vsel %vm260_vm0, %v1138_v61, 0.0 }
 0x205   : > { %v1160_v7 = vadd.f32 %v1159_v4, %v1158_v60  ;;  %v1084_v10 = vadd.f32 %v1544_v9, %v1083_v42 }
 0x206   : > { %v1546_v41 = vpop.eup %1545 }
 0x207   : > { %v1548_v1 = vpop.eup %1547  ;;  %v1123_v12 = vmul.f32 %v1546_v41, %v2092_v55  ;;  %1172 = vst.msk [vmem:[%s2112_s27 + $0x28] sm:$0xff] %vm260_vm0, %v1160_v7  ;;  %v1085_v49 = vrot.slane %v1084_v10, 2 }
 0x208   : > { %v1089_v13 = vrot.slane %v1548_v1, 4 }
 0x209   : > { %v1550_v16 = vpop.eup %1549  ;;  %v1139_v18 = vmul.f32 %v1559_v53, %v1123_v12  ;;  %v1086_v20 = vadd.f32 %v1085_v49, %v1084_v10 }
 0x20a   : > { %v1124_v19 = vmul.f32 %v1550_v16, %v2100_v0  ;;  %v1090_v21 = vadd.f32 %v1548_v1, %v1089_v13 }
 0x20b   : > { %v1087_v14 = vrot.slane %v1086_v20, 1  ;;  %v1161_v44 = vsel %vm260_vm0, %v1139_v18, 0.0 }
 0x20c   : > { %v1140_v51 = vmul.f32 %v1560_v22, %v1124_v19  ;;  %v1091_v43 = vrot.slane %v1090_v21, 2 }
 0x20d   : > { %v1088_v24 = vadd.f32 %v1087_v14, %v1086_v20 }
 0x20e   : > { %v1162_v55 = vsel %vm260_vm0, %v1140_v51, 0.0  ;;  %v1092_v48 = vadd.f32 %v1091_v43, %v1090_v21 }
 0x20f   : > { %v1163_v25 = vadd.f32 %v1162_v55, %v1161_v44  ;;  %1551 = vrcp.f32 %v1088_v24 }
 0x210   : > { %v1093_v26 = vrot.slane %v1092_v48, 1 }
 0x211   : > { %1173 = vst.msk [vmem:[%s2112_s27 + $0x30] sm:$0xff] %vm260_vm0, %v1163_v25 }
 0x212   : > { %v1094_v0 = vadd.f32 %v1093_v26, %v1092_v48 }
 0x214   : > { %1553 = vrcp.f32 %v1094_v0 }
 0x21c   : > { %v1552_v28 = vpop.eup %1551 }
 0x21d   : > { %v1125_v5 = vmul.f32 %v1552_v28, %v1544_v9 }
 0x21f   : > { %v1141_v32 = vmul.f32 %v1561_v30, %v1125_v5 }
 0x221   : > { %v1554_v29 = vpop.eup %1553  ;;  %v1164_v45 = vsel %vm260_vm0, %v1141_v32, 0.0 }
 0x222   : > { %v1126_v33 = vmul.f32 %v1554_v29, %v1548_v1 }
 0x224   : > { %v1142_v8 = vmul.f32 %v1562_v11, %v1126_v33 }
 0x226   : > { %v1165_v35 = vsel %vm260_vm0, %v1142_v8, 0.0 }
 0x227   : > { %v1166_v37 = vadd.f32 %v1165_v35, %v1164_v45 }
 0x229   : > { %1174 = vst.msk [vmem:[%s2112_s27 + $0x38] sm:$0xff] %vm260_vm0, %v1166_v37 }
 0x22a   : > { %1604 = shalt.err (!%p1601_p13)
}
 0x22b   : > { %s1605_s17 = scalar_lea.hbm %s2165_s10, 1024  ;;  %s1609_s22 = scalar_lea.hbm %s2214_s3, 8192 }
 0x22c   : > { %p1606_p1 = scmp.ne.s32.totalorder %s2165_s10, %s1605_s17  ;;  %p1610_p3 = scmp.lt.s32.totalorder %s2165_s10, %s2214_s3 }
 0x22d   : > { %p1611_p6 = scmp.lt.s32.totalorder %s1609_s22, %s1605_s17 }
 0x22e   : > { %p1607_p0 = pnand %p1606_p1, %p2223_p12 }
 0x22f   : > { %p1612_p10 = por %p1611_p6, %p1610_p3 }
 0x230   : > { %p1608_p2 = pneg %p1607_p0 }
 0x232   : > { %p1613_p11 = pnand %p1612_p10, %p1608_p2 }
 0x234   : > { %1616 = shalt.err (!%p1613_p11)
}
 0x235   : > { %s1663_s26 = smov 128   ;;  %s1664_s27 = smov 8  }
 0x236   : > { %1409 = dma.vmem_to_hbm [thread:$0]  (%p2223_p12), %s2167_s29, 1024, %s2165_s10, %s1176_s16, %s1663_s26, %s1663_s26, %s1664_s27  }
 0x237 PF: > { %p1420_p4 = scmp.ge.s32.totalorder %s1655_s15, 2  ;;  %s1204_s28 = sand.u32 1, %s1643_s12  }
 0x238   : > { %p2224_p5 = scmp.ne.s32.totalorder %s2220_s25, 0  ;;  %s1205_s30 = scalar_lea.sflag [#allocation4], %s1204_s28 }
 0x23a   : > { %p1416_p7 = pnand %p1420_p4, %p2224_p5 }
 0x23c   : > { %p1417_p8 = pneg %p1416_p7 }
 0x23e   : > { %1638 = dma.done.wait (%p1417_p8), %s1205_s30, 1024  }
 0x23f   : > { %1640 = vsyncadd (%p1417_p8), %s1205_s30, 4294966272  ;;  %p16_p9 = scmp.ge.s32.totalorder %s1710_s18, 10   ;;  %s2225_s12 = smov %s1647_s13 }
 0x240   : > { %s2226_s13 = smov %s1651_s14  ;;  %s2227_s14 = smov %s1722_s21 }
 0x241   : > { %s2228_s15 = smov %s1710_s18  ;;  %18 = sbr.rel (!%p16_p9) target bundleno = 5 (0x5), region = 80 }
 0x246   :  { %1210 = vsyncpa [#allocation3], 1 }
 0x247   :  { %1212 = vsyncpa [#allocation3 + $0x1], 1 }
 0x248   :  { %1213 = vsyncpa [#allocation4], 1 }
 0x249   :  { %1215 = vsyncpa [#allocation4 + $0x1], 1 }

</bundles_post_ra>
